<compile_context>
chip_gen: v5e
topology: v5e:2x2
jax: 0.10.0
libtpu: 0.0.40
codegen_flags: <defaults>
</compile_context>

<pallas_src>
import jax
import jax.numpy as jnp
from jax.experimental import pallas as pl
from jax.experimental.pallas import tpu as pltpu


def _cdiv(a, b):
    return -(-a // b)


def _round_up(x, m):
    return _cdiv(x, m) * m


# ----------------------------------------------------------------------------
# Kernel
# ----------------------------------------------------------------------------
def _ffn_kernel(x_ref, w1t_ref, b1_ref, w2t_ref, b2_ref, o_ref, acc_ref):
    # grid = (row_tile i, hidden_tile j); j is the accumulated (reduction) axis.
    j = pl.program_id(1)
    last = pl.num_programs(1) - 1

    @pl.when(j == 0)
    def _init():
        acc_ref[...] = jnp.zeros_like(acc_ref)

    # h = x @ W1^T  (W1 pre-transposed in the wrapper -> plain dot, no vxpose)
    h = jnp.dot(x_ref[...], w1t_ref[...],
                preferred_element_type=jnp.float32)          # (tm, th) f32
    h = jnp.maximum(h + b1_ref[...].astype(jnp.float32), 0.0)  # bias + ReLU (VPU)

    # partial = relu(...) @ W2^T  (W2 pre-transposed in the wrapper)
    partial = jnp.dot(h.astype(w2t_ref.dtype), w2t_ref[...],
                      preferred_element_type=jnp.float32)     # (tm, d_out) f32

    @pl.when(j != last)
    def _accum():
        acc_ref[...] += partial

    @pl.when(j == last)
    def _finalize():
        # Fuse the last partial product into the output store.
        o_ref[...] = (acc_ref[...] + partial +
                      b2_ref[...].astype(jnp.float32)).astype(o_ref.dtype)


# ----------------------------------------------------------------------------
# Generation-aware planning
# ----------------------------------------------------------------------------
def _chip_config():
    """Per-generation tile limits / VMEM budget / TensorCore count."""
    kind = ""
    try:
        dev = jax.devices()[0]
        if dev.platform == "tpu":
            kind = dev.device_kind.lower()
    except Exception:
        pass
    if "v7" in kind or "7x" in kind:
        # 64 MiB physical VMEM, 2 TCs/chip, ~310 FLOP/byte roofline.
        return dict(tm_max=512, th_max=512, th_align=256,
                    vmem_budget=56 << 20, num_cores=2)
    if "v6" in kind or "trillium" in kind:
        # 128 MiB VMEM, needs ~650 FLOP/byte -> big row tiles.
        return dict(tm_max=1024, th_max=512, th_align=256,
                    vmem_budget=96 << 20, num_cores=1)
    if "v5e" in kind or "v5 lite" in kind or "v5lite" in kind:
        # 128 MiB physical but 16 MiB scoped default -> must raise the limit.
        return dict(tm_max=256, th_max=512, th_align=128,
                    vmem_budget=96 << 20, num_cores=1)
    # Unknown generation (v4/v5p/interpret): conservative defaults.
    return dict(tm_max=256, th_max=512, th_align=128,
                vmem_budget=48 << 20, num_cores=1)


def _working_set_bytes(tm, th, d_model, d_output, x_bytes, w_bytes):
    """Double-buffered per-step VMEM working set + resident f32 accumulator."""
    inputs = (tm * d_model * x_bytes          # x tile
              + d_model * th * w_bytes        # W1^T tile
              + th * w_bytes                  # b1 tile
              + th * d_output * w_bytes       # W2^T tile
              + d_output * w_bytes)           # b2
    out = tm * d_output * x_bytes
    acc = tm * d_output * 4
    return 2 * (inputs + out) + acc


def _plan_rows(n_rows, cfg):
    """Row tile minimizing padding; split for 2-TC chips."""
    row_tiles = _cdiv(n_rows, cfg["tm_max"])
    tm = min(_round_up(_cdiv(n_rows, row_tiles), 8), _round_up(n_rows, 8))
    # v7x: 2 TensorCores share the 'parallel' row axis; make sure small-batch/
    # decode shapes produce >= 2 row tiles instead of serializing on one core.
    if cfg["num_cores"] >= 2 and _cdiv(n_rows, tm) < 2 and tm > 8:
        tm = _round_up(_cdiv(tm, 2), 8)
    return tm


def _plan_hidden(d_hidden, cfg):
    """Hidden tile: MXU-aligned (256, or 128 on v5e) with minimal padding."""
    th_max, th_align = cfg["th_max"], cfg["th_align"]
    d_hidden_p = _round_up(d_hidden, th_align)
    th = th_align
    cand = (th_max // th_align) * th_align
    while cand >= th_align:
        if d_hidden_p % cand == 0:
            th = cand
            break
        cand -= th_align
    return th, d_hidden_p


# ----------------------------------------------------------------------------
# One-time weight preparation (hoisted out of the per-call path)
# ----------------------------------------------------------------------------
def prepare_ffn_weights(w1, b1, w2, b2, cfg=None):
    """Transpose + zero-pad the PyTorch-layout weights into kernel layout.

    w1: [d_hidden, d_model], b1: [d_hidden]   (linear1)
    w2: [d_output, d_hidden], b2: [d_output]  (linear2)
    Call this ONCE and reuse the result; doing it per forward call would
    re-stream both weight matrices through HBM every call.
    """
    if cfg is None:
        cfg = _chip_config()
    d_hidden, _ = w1.shape
    d_output = w2.shape[0]

    th, d_hidden_p = _plan_hidden(d_hidden, cfg)

    w1t = w1.T                                  # (d_model, d_hidden)
    w2t = w2.T                                  # (d_hidden, d_output)
    b1p = b1
    if d_hidden_p != d_hidden:
        pad_h = d_hidden_p - d_hidden
        # Zero padding is load-bearing: relu(x @ 0 + 0) = 0 and the padded
        # rows of W2^T are 0, so padded hidden units contribute exactly 0.
        w1t = jnp.pad(w1t, ((0, 0), (0, pad_h)))
        b1p = jnp.pad(b1p, ((0, pad_h),))
        w2t = jnp.pad(w2t, ((0, pad_h), (0, 0)))

    return dict(
        w1t=w1t,
        b1=b1p.reshape(1, d_hidden_p),
        w2t=w2t,
        b2=b2.reshape(1, d_output),
        th=th,
        cfg=cfg,
    )


# ----------------------------------------------------------------------------
# Forward pass
# ----------------------------------------------------------------------------
def feed_forward_prepared(x, prep):
    """FeedForward.forward(x) (inference, dropout = identity), prepared weights."""
    cfg = prep["cfg"]
    w1t, b1, w2t, b2 = prep["w1t"], prep["b1"], prep["w2t"], prep["b2"]
    th = prep["th"]
    d_model, d_hidden_p = w1t.shape
    d_output = w2t.shape[1]

    orig_shape = x.shape
    assert orig_shape[-1] == d_model
    n_rows = 1
    for s in orig_shape[:-1]:
        n_rows *= s

    x_bytes = jnp.dtype(x.dtype).itemsize
    w_bytes = jnp.dtype(w1t.dtype).itemsize

    # --- tile planning under the per-chip VMEM budget ---
    tm = _plan_rows(n_rows, cfg)
    budget = cfg["vmem_budget"]
    while tm > 8 and _working_set_bytes(tm, th, d_model, d_output,
                                        x_bytes, w_bytes) > budget:
        tm = _round_up(tm // 2, 8)
    while (_working_set_bytes(tm, th, d_model, d_output, x_bytes, w_bytes)
           > budget and th % 256 == 0 and d_hidden_p % (th // 2) == 0):
        th //= 2

    n_rows_p = _round_up(n_rows, tm)
    x2 = x.reshape(n_rows, d_model)
    if n_rows_p != n_rows:
        x2 = jnp.pad(x2, ((0, n_rows_p - n_rows), (0, 0)))

    grid = (n_rows_p // tm, d_hidden_p // th)

    ws = _working_set_bytes(tm, th, d_model, d_output, x_bytes, w_bytes)
    vmem_limit = int(min(budget, max(32 << 20, int(ws * 1.25) + (2 << 20))))

    out = pl.pallas_call(
        _ffn_kernel,
        out_shape=jax.ShapeDtypeStruct((n_rows_p, d_output), x.dtype),
        grid_spec=pltpu.PrefetchScalarGridSpec(
            num_scalar_prefetch=0,
            grid=grid,
            in_specs=[
                pl.BlockSpec((tm, d_model), lambda i, j: (i, 0)),     # x rows
                pl.BlockSpec((d_model, th), lambda i, j: (0, j)),     # W1^T chunk
                pl.BlockSpec((1, th), lambda i, j: (0, j)),           # b1 chunk
                pl.BlockSpec((th, d_output), lambda i, j: (j, 0)),    # W2^T chunk
                pl.BlockSpec((1, d_output), lambda i, j: (0, 0)),     # b2 (full)
            ],
            out_specs=pl.BlockSpec((tm, d_output), lambda i, j: (i, 0)),
            scratch_shapes=[pltpu.VMEM((tm, d_output), jnp.float32)],
        ),
        compiler_params=pltpu.CompilerParams(
            dimension_semantics=("parallel", "arbitrary"),
            vmem_limit_bytes=vmem_limit),
    )(x2, w1t, b1, w2t, b2)

    out = out[:n_rows]
    return out.reshape(*orig_shape[:-1], d_output)


def feed_forward(x, w1, b1, w2, b2):
    """Convenience wrapper (weight prep runs per call; for real inference call
    prepare_ffn_weights once and use feed_forward_prepared)."""
    return feed_forward_prepared(x, prepare_ffn_weights(w1, b1, w2, b2))


# ----------------------------------------------------------------------------
# Reference + test
# ----------------------------------------------------------------------------
def _reference(x, w1, b1, w2, b2):
    h = jnp.maximum(
        jnp.einsum("...d,hd->...h", x, w1,
                   precision=jax.lax.Precision.HIGHEST) + b1, 0.0)
    y = jnp.einsum("...h,oh->...o", h, w2,
                   precision=jax.lax.Precision.HIGHEST) + b2
    return y.astype(x.dtype)


if __name__ == "__main__":
    B, T, d_model, d_hidden = 2, 8, 32, 64
    d_output = d_model

    k0, k1, k2, k3, k4 = jax.random.split(jax.random.PRNGKey(0), 5)
    x = jax.random.normal(k0, (B, T, d_model), dtype=jnp.float32)
    w1 = jax.random.normal(k1, (d_hidden, d_model), dtype=jnp.float32) * 0.1
    b1 = jax.random.normal(k2, (d_hidden,), dtype=jnp.float32) * 0.1
    w2 = jax.random.normal(k3, (d_output, d_hidden), dtype=jnp.float32) * 0.1
    b2 = jax.random.normal(k4, (d_output,), dtype=jnp.float32) * 0.1

    # One-time weight prep (transpose + pad) hoisted out of the call path.
    prep = prepare_ffn_weights(w1, b1, w2, b2)
    out = feed_forward_prepared(x, prep)
    out = jax.block_until_ready(out)

    ref = _reference(x, w1, b1, w2, b2)
    assert out.shape == (B, T, d_output)
    assert jnp.allclose(out, ref, atol=1e-3, rtol=1e-3), "mismatch vs reference"

    print("KERNEL_OK")
</pallas_src>

<mosaic_0001>
module attributes {stable_mosaic.version = 11 : i64} {
  func.func @_ffn_kernel(%arg0: i32, %arg1: i32, %arg2: memref<16x32xf32, #tpu.memory_space<vmem>>, %arg3: memref<32x128xf32, #tpu.memory_space<vmem>>, %arg4: memref<1x128xf32, #tpu.memory_space<vmem>>, %arg5: memref<128x32xf32, #tpu.memory_space<vmem>>, %arg6: memref<1x32xf32, #tpu.memory_space<vmem>>, %arg7: memref<16x32xf32, #tpu.memory_space<vmem>>, %arg8: memref<16x32xf32, #tpu.memory_space<vmem>>) attributes {dimension_semantics = [#tpu.dimension_semantics<parallel>, #tpu.dimension_semantics<arbitrary>], iteration_bounds = array<i64: 1, 1>, scalar_prefetch = 0 : i64, scratch_operands = 1 : i64, tpu.core_type = #tpu.core_type<tc>, window_params = [{transform_indices = @transform_0, window_bounds = array<i64: 16, 32>}, {transform_indices = @transform_1, window_bounds = array<i64: 32, 128>}, {transform_indices = @transform_2, window_bounds = array<i64: 1, 128>}, {transform_indices = @transform_3, window_bounds = array<i64: 128, 32>}, {pipeline_mode = #tpu.pipeline_mode<synchronous>, transform_indices = @transform_4, window_bounds = array<i64: 1, 32>}, {transform_indices = @transform_5, window_bounds = array<i64: 16, 32>}]} {
    %c0_i32 = arith.constant 0 : i32
    %0 = arith.cmpi eq, %arg1, %c0_i32 : i32
    %1 = arith.extui %0 : i1 to i32
    %c0_i32_0 = arith.constant 0 : i32
    %2 = arith.cmpi ne, %1, %c0_i32_0 : i32
    scf.if %2 {
      %cst_14 = arith.constant 0.000000e+00 : f32
      %19 = vector.broadcast %cst_14 : f32 to vector<16x32xf32>
      %c0_15 = arith.constant 0 : index
      %c0_16 = arith.constant 0 : index
      %20 = vector.load %arg8[%c0_15, %c0_16] : memref<16x32xf32, #tpu.memory_space<vmem>>, vector<16x32xf32>
      tpu.vector_store %arg8[%c0_15, %c0_16], %19 {strides = array<i32>} : memref<16x32xf32, #tpu.memory_space<vmem>>, vector<16x32xf32>,
    } else {
    }
    %c0 = arith.constant 0 : index
    %c0_1 = arith.constant 0 : index
    %3 = vector.load %arg2[%c0, %c0_1] : memref<16x32xf32, #tpu.memory_space<vmem>>, vector<16x32xf32>
    %c0_2 = arith.constant 0 : index
    %c0_3 = arith.constant 0 : index
    %4 = vector.load %arg3[%c0_2, %c0_3] : memref<32x128xf32, #tpu.memory_space<vmem>>, vector<32x128xf32>
    %cst = arith.constant dense<0.000000e+00> : vector<16x128xf32>
    %5 = tpu.matmul %3, %4, %cst {dimension_numbers = #tpu.dot_dimension_numbers<[1], [0], [0], [1], [0, 0, 1, 1], [], []>} : vector<16x32xf32>, vector<32x128xf32>, vector<16x128xf32> -> vector<16x128xf32>
    %c0_4 = arith.constant 0 : index
    %c0_5 = arith.constant 0 : index
    %6 = vector.load %arg4[%c0_4, %c0_5] : memref<1x128xf32, #tpu.memory_space<vmem>>, vector<1x128xf32>
    %7 = vector.broadcast %6 : vector<1x128xf32> to vector<16x128xf32>
    %8 = arith.addf %5, %7 : vector<16x128xf32>
    %cst_6 = arith.constant 0.000000e+00 : f32
    %9 = vector.broadcast %cst_6 : f32 to vector<16x128xf32>
    %10 = arith.maximumf %8, %9 : vector<16x128xf32>
    %c0_7 = arith.constant 0 : index
    %c0_8 = arith.constant 0 : index
    %11 = vector.load %arg5[%c0_7, %c0_8] : memref<128x32xf32, #tpu.memory_space<vmem>>, vector<128x32xf32>
    %cst_9 = arith.constant dense<0.000000e+00> : vector<16x32xf32>
    %12 = tpu.matmul %10, %11, %cst_9 {dimension_numbers = #tpu.dot_dimension_numbers<[1], [0], [0], [1], [0, 0, 1, 1], [], []>} : vector<16x128xf32>, vector<128x32xf32>, vector<16x32xf32> -> vector<16x32xf32>
    %c0_i32_10 = arith.constant 0 : i32
    %13 = arith.cmpi ne, %arg1, %c0_i32_10 : i32
    %14 = arith.extui %13 : i1 to i32
    %c0_i32_11 = arith.constant 0 : i32
    %15 = arith.cmpi ne, %14, %c0_i32_11 : i32
    scf.if %15 {
      %c0_14 = arith.constant 0 : index
      %c0_15 = arith.constant 0 : index
      %19 = vector.load %arg8[%c0_14, %c0_15] : memref<16x32xf32, #tpu.memory_space<vmem>>, vector<16x32xf32>
      %20 = arith.addf %19, %12 : vector<16x32xf32>
      %c0_16 = arith.constant 0 : index
      %c0_17 = arith.constant 0 : index
      %21 = vector.load %arg8[%c0_16, %c0_17] : memref<16x32xf32, #tpu.memory_space<vmem>>, vector<16x32xf32>
      tpu.vector_store %arg8[%c0_16, %c0_17], %20 {strides = array<i32>} : memref<16x32xf32, #tpu.memory_space<vmem>>, vector<16x32xf32>,
    } else {
    }
    %c0_i32_12 = arith.constant 0 : i32
    %16 = arith.cmpi eq, %arg1, %c0_i32_12 : i32
    %17 = arith.extui %16 : i1 to i32
    %c0_i32_13 = arith.constant 0 : i32
    %18 = arith.cmpi ne, %17, %c0_i32_13 : i32
    scf.if %18 {
      %c0_14 = arith.constant 0 : index
      %c0_15 = arith.constant 0 : index
      %19 = vector.load %arg8[%c0_14, %c0_15] : memref<16x32xf32, #tpu.memory_space<vmem>>, vector<16x32xf32>
      %20 = arith.addf %19, %12 : vector<16x32xf32>
      %c0_16 = arith.constant 0 : index
      %c0_17 = arith.constant 0 : index
      %21 = vector.load %arg6[%c0_16, %c0_17] : memref<1x32xf32, #tpu.memory_space<vmem>>, vector<1x32xf32>
      %22 = vector.broadcast %21 : vector<1x32xf32> to vector<16x32xf32>
      %23 = arith.addf %20, %22 : vector<16x32xf32>
      %c0_18 = arith.constant 0 : index
      %c0_19 = arith.constant 0 : index
      %24 = vector.load %arg7[%c0_18, %c0_19] : memref<16x32xf32, #tpu.memory_space<vmem>>, vector<16x32xf32>
      tpu.vector_store %arg7[%c0_18, %c0_19], %23 {strides = array<i32>} : memref<16x32xf32, #tpu.memory_space<vmem>>, vector<16x32xf32>,
    } else {
    }
    return
  }
  func.func @transform_0(%arg0: i32, %arg1: i32) -> (i32, i32) {
    %c0_i32 = arith.constant 0 : i32
    %c0_i32_0 = arith.constant 0 : i32
    return %arg0, %c0_i32 : i32, i32
  }
  func.func @transform_1(%arg0: i32, %arg1: i32) -> (i32, i32) {
    %c0_i32 = arith.constant 0 : i32
    %c0_i32_0 = arith.constant 0 : i32
    return %c0_i32, %arg1 : i32, i32
  }
  func.func @transform_2(%arg0: i32, %arg1: i32) -> (i32, i32) {
    %c0_i32 = arith.constant 0 : i32
    %c0_i32_0 = arith.constant 0 : i32
    return %c0_i32, %arg1 : i32, i32
  }
  func.func @transform_3(%arg0: i32, %arg1: i32) -> (i32, i32) {
    %c0_i32 = arith.constant 0 : i32
    %c0_i32_0 = arith.constant 0 : i32
    return %arg1, %c0_i32 : i32, i32
  }
  func.func @transform_4(%arg0: i32, %arg1: i32) -> (i32, i32) {
    %c0_i32 = arith.constant 0 : i32
    %c0_i32_0 = arith.constant 0 : i32
    %c0_i32_1 = arith.constant 0 : i32
    return %c0_i32, %c0_i32_0 : i32, i32
  }
  func.func @transform_5(%arg0: i32, %arg1: i32) -> (i32, i32) {
    %c0_i32 = arith.constant 0 : i32
    %c0_i32_0 = arith.constant 0 : i32
    return %arg0, %c0_i32 : i32, i32
  }
}

</mosaic_0001>

<bundles_post_ra>
// kernel: tpu_custom_call.1
= control target key start
LH: loop header
LB: loop body
LE: loop exit
PB: predicated region body
PF: predicated region fallthrough
CT: control target
= control target key end

     0   :  { %vm25_vm0 = vcmask 261120   ;;  %v202_v2 = vmov 0.0   ;;  %s317_s0 = inlined_call_operand.vmem [shape: f32[16,32], index: 0, kind: input, shape index: {}]   ;;  %s318_s1 = inlined_call_operand.vmem [shape: f32[32,128], index: 1, kind: input, shape index: {}]   ;;  %s319_s2 = inlined_call_operand.vmem [shape: f32[1,128], index: 2, kind: input, shape index: {}]   ;;  %s320_s3 = inlined_call_operand.vmem [shape: f32[128,32], index: 3, kind: input, shape index: {}]   ;;  %s321_s4 = inlined_call_operand.vmem [shape: f32[1,32], index: 4, kind: input, shape index: {}]   ;;  %s322_s5 = inlined_call_operand.hbm [shape: f32[16,32], index: 5, kind: output, shape index: {}]  }
   0x1   :  { %v33_v0 = vld [vmem:[%s318_s1 + $0x18] sm:$0xff]  ;;  %v32_v1 = vld [vmem:[%s318_s1 + $0x10] sm:$0xff]  ;;  %26 = vst.msk [vmem:[#allocation2] sm:$0xff] %vm25_vm0, %v202_v2  ;;  %v31_v3 = vld [vmem:[%s318_s1 + $0x8] sm:$0xff] }
   0x2   :  { %57 = vmatpush.msra.mxu0 %v33_v0  ;;  %27 = vst.msk [vmem:[#allocation2 + $0x8] sm:$0xff] %vm25_vm0, %v202_v2  ;;  %v85_v4 = vld [vmem:[%s320_s3 + $0x78] sm:$0xff]  ;;  %v84_v5 = vld [vmem:[%s320_s3 + $0x70] sm:$0xff]  ;;  %v30_v6 = vld [vmem:[%s318_s1] sm:$0xff] }
   0x3   :  { %86 = vmatpush.msra.mxu1 %v85_v4  ;;  %v83_v7 = vld [vmem:[%s320_s3 + $0x68] sm:$0xff]  ;;  %154 = vmatpush.msra.mxu2 %v85_v4  ;;  %v28_v8 = vld [vmem:[%s317_s0] sm:$0xff] }
   0x4   :  { %58 = vmatpush.msra.mxu0 %v32_v1  ;;  %v82_v9 = vld [vmem:[%s320_s3 + $0x60] sm:$0xff] }
   0x5   :  { %87 = vmatpush.msra.mxu1 %v84_v5  ;;  %155 = vmatpush.msra.mxu2 %v84_v5 }
   0x6   :  { %59 = vmatpush.msra.mxu0 %v31_v3 }
   0x7   :  { %88 = vmatpush.msra.mxu1 %v83_v7 }
   0x8   :  { %60 = vmatpush.msra.mxu0 %v30_v6 }
   0x9   :  { %10 = vsyncpa [#allocation4], 0  ;;  %152 = vmatmul.msk.f32.vlgmr.msra.gmra.mxu0 %vm25_vm0, %v28_v8  ;;  %v81_v10 = vld [vmem:[%s320_s3 + $0x58] sm:$0xff]  ;;  %156 = vmatpush.msra.mxu2 %v83_v7  ;;  %v80_v11 = vld [vmem:[%s320_s3 + $0x50] sm:$0xff]  ;;  %s140_s15 = sshll.u32 %s322_s5, 4  ;;  %s205_s16 = smov 8   ;;  %s141_s15 = int_to_ptr.hbm [resolvable:$true] %s140_s15 }
   0xa   :  { %89 = vmatpush.msra.mxu1 %v82_v9  ;;  %v79_v12 = vld [vmem:[%s320_s3 + $0x48] sm:$0xff]  ;;  %v78_v14 = vld [vmem:[%s320_s3 + $0x40] sm:$0xff]  ;;  %v77_v15 = vld [vmem:[%s320_s3 + $0x38] sm:$0xff] }
   0xb   :  { %157 = vmatpush.msra.mxu2 %v82_v9  ;;  %v29_v13 = vld [vmem:[%s317_s0 + $0x8] sm:$0xff]  ;;  %v76_v16 = vld [vmem:[%s320_s3 + $0x30] sm:$0xff]  ;;  %v74_v18 = vld [vmem:[%s320_s3 + $0x20] sm:$0xff] }
   0xc   :  { %90 = vmatpush.msra.mxu1 %v81_v10  ;;  %v75_v17 = vld [vmem:[%s320_s3 + $0x28] sm:$0xff]  ;;  %v73_v19 = vld [vmem:[%s320_s3 + $0x18] sm:$0xff]  ;;  %v72_v20 = vld [vmem:[%s320_s3 + $0x10] sm:$0xff] }
   0xd   :  { %158 = vmatpush.msra.mxu2 %v81_v10  ;;  %v71_v21 = vld [vmem:[%s320_s3 + $0x8] sm:$0xff]  ;;  %v70_v22 = vld [vmem:[%s320_s3] sm:$0xff] }
   0xe   :  { %91 = vmatpush.msra.mxu1 %v80_v11  ;;  %v174_v23 = vld [vmem:[%s319_s2] ss:$0 sm:$0xff]  ;;  %v123_v35 = vld [vmem:[#allocation2 + $0x8] sm:$0xff]  ;;  %s203_s2 = smov [#allocation3]  }
   0xf   :  { %159 = vmatpush.msra.mxu2 %v80_v11  ;;  %v122_v30 = vld [vmem:[#allocation2] sm:$0xff]  ;;  %s138_s3 = sshll.u32 %s203_s2, 4  ;;  %s139_s3 = int_to_ptr.vmem [resolvable:$true] %s138_s3 }
  0x10   :  { %92 = vmatpush.msra.mxu1 %v79_v12  ;;  %v175_v31 = vld [vmem:[%s321_s4] ss:$0 sm:$0xff]  ;;  %s204_s4 = smov 128  }
  0x11   :  { %153 = vmatmul.msk.f32.gmra.mxu0 %vm25_vm0, %v29_v13  ;;  %160 = vmatpush.msra.mxu2 %v79_v12 }
  0x12   :  { %93 = vmatpush.msra.mxu1 %v78_v14 }
  0x13   :  { %161 = vmatpush.msra.mxu2 %v78_v14 }
  0x14   :  { %94 = vmatpush.msra.mxu1 %v77_v15 }
  0x15   :  { %162 = vmatpush.msra.mxu2 %v77_v15 }
  0x16   :  { %95 = vmatpush.msra.mxu1 %v76_v16 }
  0x17   :  { %163 = vmatpush.msra.mxu2 %v76_v16 }
  0x18   :  { %96 = vmatpush.msra.mxu1 %v75_v17 }
  0x19   :  { %164 = vmatpush.msra.mxu2 %v75_v17 }
  0x1a   :  { %97 = vmatpush.msra.mxu1 %v74_v18 }
  0x1b   :  { %165 = vmatpush.msra.mxu2 %v74_v18 }
  0x1c   :  { %98 = vmatpush.msra.mxu1 %v73_v19 }
  0x1d   :  { %166 = vmatpush.msra.mxu2 %v73_v19 }
  0x1e   :  { %99 = vmatpush.msra.mxu1 %v72_v20 }
  0x1f   :  { %167 = vmatpush.msra.mxu2 %v72_v20 }
  0x20   :  { %100 = vmatpush.msra.mxu1 %v71_v21 }
  0x21   :  { %168 = vmatpush.msra.mxu2 %v71_v21 }
  0x22   :  { %101 = vmatpush.msra.mxu1 %v70_v22 }
  0x23   :  { %169 = vmatpush.msra.mxu2 %v70_v22 }
  0x86   :  { %v62_v24 = vpop.f32.mrf.mxu0 }
  0x87   :  { %v63_v25 = vadd.f32 %v174_v23, %v62_v24 }
  0x89   :  { %v68_v26 = vmax.f32 %v63_v25, 0.0 }
  0x8b   :  { %102 = vmatmul.f32.vlgmr.msra.gmra.mxu1 %v68_v26 }
  0x8e   :  { %v65_v27 = vpop.f32.mrf.mxu0 }
  0x8f   :  { %v66_v28 = vadd.f32 %v174_v23, %v65_v27 }
  0x91   :  { %v69_v29 = vmax.f32 %v66_v28, 0.0 }
  0x93   :  { %105 = vmatmul.f32.vlgmr.msra.gmra.mxu2 %v69_v29 }
 0x108   :  { %v103_v32 = vpop.f32.mrf.mxu1 }
 0x109   :  { %v124_v33 = vadd.f32 %v122_v30, %v103_v32 }
 0x10b   :  { %v130_v34 = vadd.f32 %v175_v31, %v124_v33 }
 0x10d   :  { %132 = vst.msk [vmem:[#allocation3] sm:$0xff] %vm25_vm0, %v130_v34 }
 0x116   :  { %v106_v36 = vpop.f32.mrf.mxu2 }
 0x117   :  { %v125_v37 = vadd.f32 %v123_v35, %v106_v36 }
 0x119   :  { %v131_v38 = vadd.f32 %v175_v31, %v125_v37 }
 0x11b   :  { %133 = vst.msk [vmem:[#allocation3 + $0x8] sm:$0xff] %vm25_vm0, %v131_v38 }
 0x11c   :  { %146 = dma.vmem_to_hbm [thread:$0]  %s139_s3, 256, %s141_s15, [#allocation4], %s204_s4, %s204_s4, %s205_s16  }
 0x11d   :  { %200 = dma.done.wait [#allocation4], 256  }
 0x11e   :  { %201 = vsyncadd [#allocation4], 4294967040 }
 0x11f   :  { %151 = vsyncpa [#allocation4], 1 }

</bundles_post_ra>
